<compile_context>
chip_gen: v7x
topology: tpu7x:2x2x1
jax: 0.10.0
libtpu: 0.0.40
codegen_flags: <defaults>
</compile_context>

<pallas_src>
import functools

import jax
import jax.numpy as jnp
from jax.experimental import pallas as pl
from jax.experimental.pallas import tpu as pltpu

EPS = 1e-5


def _resblock_kernel(x_ref, hidx_ref, widx_ref, w1_ref, g1_ref, b1_ref,
                     w2_ref, g2_ref, b2_ref, out_ref, *, H, W):
    """Fused residual block, channel-on-sublane / (H*W)-on-lane layout.

    x_ref      : (B, C, H*W) f32   input (also the identity shortcut)
    hidx/widx  : (1, H*W) int32    row / col index of each flat spatial pos
    w1/w2      : (C, 9*C)  bf16    conv weights, im2col layout (tap-major)
    g*/b*      : (C, 1)    f32     BN gamma / beta
    out_ref    : (B, C, H*W) f32
    """
    B, C, HW = x_ref.shape
    P = B * HW

    hid = hidx_ref[...]                       # (1, HW) int32
    wid = widx_ref[...]                       # (1, HW) int32

    # Per-tap validity masks: tap (dh, dw) reads x[h+dh, w+dw]; out-of-image
    # taps must contribute zero (emulates the conv's zero padding).  Built
    # once, reused by both convs and all batches.
    masks = {}
    for dh in (-1, 0, 1):
        for dw in (-1, 0, 1):
            parts = []
            if dh == -1:
                parts.append(hid >= 1)
            elif dh == 1:
                parts.append(hid <= H - 2)
            if dw == -1:
                parts.append(wid >= 1)
            elif dw == 1:
                parts.append(wid <= W - 2)
            m = None
            for p in parts:
                m = p if m is None else (m & p)
            masks[(dh, dw)] = m

    def conv3x3(xs, w_ref):
        """xs: list of B arrays (C, HW) f32 -> list of B arrays (C, HW) f32."""
        w = w_ref[...]                                        # (C, 9C) bf16
        outs = []
        for xb in xs:
            taps = []
            for kh in range(3):
                for kw in range(3):
                    dh, dw = kh - 1, kw - 1
                    shift = (-(dh * W + dw)) % HW
                    t = xb if shift == 0 else pltpu.roll(xb, shift=shift, axis=1)
                    m = masks[(dh, dw)]
                    if m is not None:
                        t = jnp.where(m, t, 0.0)              # f32 select
                    taps.append(t)
            # Taps stack along sublanes (tap-major, channel-minor) -> (9C, HW);
            # single cast to bf16 for the MXU operands, f32 accumulation.
            patch = jnp.concatenate(taps, axis=0).astype(jnp.bfloat16)
            outs.append(jnp.dot(w, patch, preferred_element_type=jnp.float32))
        return outs

    def batchnorm(accs, g_ref, b_ref):
        """Training-mode BN over (B, H, W); two-pass variance; reuses d."""
        mean = sum(jnp.sum(a, axis=1, keepdims=True) for a in accs) / P    # (C,1)
        ds = [a - mean for a in accs]
        var = sum(jnp.sum(d * d, axis=1, keepdims=True) for d in ds) / P   # (C,1)
        scale = g_ref[...] * jax.lax.rsqrt(var + EPS)                      # (C,1)
        shift = b_ref[...]                                                 # (C,1)
        return [d * scale + shift for d in ds]

    xs = [x_ref[b] for b in range(B)]                         # (C, HW) f32 each

    # conv1 -> BN1 -> ReLU
    ys = [jnp.maximum(y, 0.0)
          for y in batchnorm(conv3x3(xs, w1_ref), g1_ref, b1_ref)]
    # conv2 -> BN2
    zs = batchnorm(conv3x3(ys, w2_ref), g2_ref, b2_ref)
    # identity shortcut + final ReLU (HW % 128 == 0 -> unmasked lane-dense store)
    for b in range(B):
        out_ref[b] = jnp.maximum(zs[b] + xs[b], 0.0).astype(out_ref.dtype)


@jax.jit
def residual_block_pallas(x_nchw, w1, g1, b1, w2, g2, b2):
    """x_nchw: (B, Cin, H, W) f32.  Conv weights in PyTorch layout (Cout, Cin, 3, 3)."""
    B, Cin, H, W = x_nchw.shape
    Cout = w1.shape[0]
    # identity shortcut (self.right is None) requires matching shapes, stride 1
    assert Cin == Cout, "identity shortcut requires inchannel == outchannel"
    HW = H * W

    # Pure metadata reshape NCHW -> (B, C, H*W): no transpose, no pad, no
    # extra HBM array.
    x3d = x_nchw.reshape(B, Cin, HW).astype(jnp.float32)

    # (Cout, Cin, kh, kw) -> (Cout, kh, kw, Cin) -> (Cout, 9*Cin): tap-major,
    # channel-minor, matching the in-kernel patch layout.  bf16 MXU operands.
    w1m = jnp.transpose(w1, (0, 2, 3, 1)).reshape(Cout, 9 * Cin).astype(jnp.bfloat16)
    w2m = jnp.transpose(w2, (0, 2, 3, 1)).reshape(Cout, 9 * Cout).astype(jnp.bfloat16)

    # Flat-position row/col indices (computed once by XLA); used to build the
    # boundary masks in-kernel without integer div/mod on the VPU.
    q = jnp.arange(HW, dtype=jnp.int32)
    hidx = (q // W).reshape(1, HW)
    widx = (q % W).reshape(1, HW)

    flops = 2 * 2 * B * HW * Cout * (9 * Cin)            # two im2col GEMMs
    bytes_accessed = (2 * B * Cin * HW * 4               # input + output
                      + 2 * 9 * Cin * Cout * 2           # bf16 weights
                      + 2 * HW * 4 + 4 * Cout * 4)       # indices + BN params

    out3d = pl.pallas_call(
        functools.partial(_resblock_kernel, H=H, W=W),
        out_shape=jax.ShapeDtypeStruct((B, Cout, HW), jnp.float32),
        in_specs=[pl.BlockSpec(memory_space=pltpu.MemorySpace.VMEM)] * 9,
        out_specs=pl.BlockSpec(memory_space=pltpu.MemorySpace.VMEM),
        cost_estimate=pl.CostEstimate(flops=flops, transcendentals=2 * Cout,
                                      bytes_accessed=bytes_accessed),
    )(x3d, hidx, widx,
      w1m, g1.reshape(Cout, 1).astype(jnp.float32),
      b1.reshape(Cout, 1).astype(jnp.float32),
      w2m, g2.reshape(Cout, 1).astype(jnp.float32),
      b2.reshape(Cout, 1).astype(jnp.float32))

    # Pure metadata reshape back to NCHW -- no transpose needed.
    return out3d.reshape(B, Cout, H, W)


def _reference(x, w1, g1, b1, w2, g2, b2):
    """Plain-JAX reference, NCHW throughout (training-mode BN, eps=1e-5)."""
    def conv3x3(inp, w):  # w: (Cout, Cin, 3, 3)
        return jax.lax.conv_general_dilated(
            inp, w, window_strides=(1, 1), padding=((1, 1), (1, 1)),
            dimension_numbers=("NCHW", "OIHW", "NCHW"))

    def bn(inp, g, b):
        mean = jnp.mean(inp, axis=(0, 2, 3), keepdims=True)
        var = jnp.mean((inp - mean) ** 2, axis=(0, 2, 3), keepdims=True)
        return ((inp - mean) * jax.lax.rsqrt(var + EPS) * g.reshape(1, -1, 1, 1)
                + b.reshape(1, -1, 1, 1))

    y = jnp.maximum(bn(conv3x3(x, w1), g1, b1), 0.0)
    z = bn(conv3x3(y, w2), g2, b2)
    return jnp.maximum(z + x, 0.0)


if __name__ == "__main__":
    B, C, H, W = 2, 8, 16, 16  # identity shortcut => inchannel == outchannel, stride 1
    key = jax.random.PRNGKey(0)
    kx, kw1, kw2 = jax.random.split(key, 3)

    x = jax.random.normal(kx, (B, C, H, W), jnp.float32)
    # Deterministic parameter init; BN affine defaults: gamma=1, beta=0.
    w1 = jax.random.normal(kw1, (C, C, 3, 3), jnp.float32) * (1.0 / (3 * (C ** 0.5)))
    w2 = jax.random.normal(kw2, (C, C, 3, 3), jnp.float32) * (1.0 / (3 * (C ** 0.5)))
    g1 = jnp.ones((C,), jnp.float32)
    b1 = jnp.zeros((C,), jnp.float32)
    g2 = jnp.ones((C,), jnp.float32)
    b2 = jnp.zeros((C,), jnp.float32)

    out = jax.block_until_ready(residual_block_pallas(x, w1, g1, b1, w2, g2, b2))
    ref = _reference(x, w1, g1, b1, w2, g2, b2)

    assert out.shape == (B, C, H, W)
    # Kernel carries GEMM operands in bf16 (f32 accumulation); the reference
    # uses XLA's default (bf16-based) conv path.  Tolerance covers the operand
    # rounding (incl. the extra bf16 round-trip of the conv2 input) and
    # summation-order differences.
    max_err = jnp.max(jnp.abs(out - ref))
    assert jnp.allclose(out, ref, rtol=2e-2, atol=2e-2), f"max abs err {max_err}"

    print("KERNEL_OK")
</pallas_src>

<mosaic_0001>
module attributes {stable_mosaic.version = 11 : i64} {
  func.func @_resblock_kernel(%arg0: memref<2x8x256xf32, #tpu.memory_space<vmem>>, %arg1: memref<1x256xi32, #tpu.memory_space<vmem>>, %arg2: memref<1x256xi32, #tpu.memory_space<vmem>>, %arg3: memref<8x72xbf16, #tpu.memory_space<vmem>>, %arg4: memref<8x1xf32, #tpu.memory_space<vmem>>, %arg5: memref<8x1xf32, #tpu.memory_space<vmem>>, %arg6: memref<8x72xbf16, #tpu.memory_space<vmem>>, %arg7: memref<8x1xf32, #tpu.memory_space<vmem>>, %arg8: memref<8x1xf32, #tpu.memory_space<vmem>>, %arg9: memref<2x8x256xf32, #tpu.memory_space<vmem>>) attributes {dimension_semantics = [], scalar_prefetch = 0 : i64, scratch_operands = 0 : i64, tpu.core_type = #tpu.core_type<tc>} {
    %c0 = arith.constant 0 : index
    %c0_0 = arith.constant 0 : index
    %0 = vector.load %arg1[%c0, %c0_0] : memref<1x256xi32, #tpu.memory_space<vmem>>, vector<1x256xi32>
    %c0_1 = arith.constant 0 : index
    %c0_2 = arith.constant 0 : index
    %1 = vector.load %arg2[%c0_1, %c0_2] : memref<1x256xi32, #tpu.memory_space<vmem>>, vector<1x256xi32>
    %c1_i32 = arith.constant 1 : i32
    %2 = vector.broadcast %c1_i32 : i32 to vector<1x256xi32>
    %3 = arith.cmpi sge, %0, %2 : vector<1x256xi32>
    %c1_i32_3 = arith.constant 1 : i32
    %4 = vector.broadcast %c1_i32_3 : i32 to vector<1x256xi32>
    %5 = arith.cmpi sge, %1, %4 : vector<1x256xi32>
    %6 = arith.andi %3, %5 : vector<1x256xi1>
    %c1_i32_4 = arith.constant 1 : i32
    %7 = vector.broadcast %c1_i32_4 : i32 to vector<1x256xi32>
    %8 = arith.cmpi sge, %0, %7 : vector<1x256xi32>
    %c1_i32_5 = arith.constant 1 : i32
    %9 = vector.broadcast %c1_i32_5 : i32 to vector<1x256xi32>
    %10 = arith.cmpi sge, %0, %9 : vector<1x256xi32>
    %c14_i32 = arith.constant 14 : i32
    %11 = vector.broadcast %c14_i32 : i32 to vector<1x256xi32>
    %12 = arith.cmpi sle, %1, %11 : vector<1x256xi32>
    %13 = arith.andi %10, %12 : vector<1x256xi1>
    %c1_i32_6 = arith.constant 1 : i32
    %14 = vector.broadcast %c1_i32_6 : i32 to vector<1x256xi32>
    %15 = arith.cmpi sge, %1, %14 : vector<1x256xi32>
    %c14_i32_7 = arith.constant 14 : i32
    %16 = vector.broadcast %c14_i32_7 : i32 to vector<1x256xi32>
    %17 = arith.cmpi sle, %1, %16 : vector<1x256xi32>
    %c14_i32_8 = arith.constant 14 : i32
    %18 = vector.broadcast %c14_i32_8 : i32 to vector<1x256xi32>
    %19 = arith.cmpi sle, %0, %18 : vector<1x256xi32>
    %c1_i32_9 = arith.constant 1 : i32
    %20 = vector.broadcast %c1_i32_9 : i32 to vector<1x256xi32>
    %21 = arith.cmpi sge, %1, %20 : vector<1x256xi32>
    %22 = arith.andi %19, %21 : vector<1x256xi1>
    %c14_i32_10 = arith.constant 14 : i32
    %23 = vector.broadcast %c14_i32_10 : i32 to vector<1x256xi32>
    %24 = arith.cmpi sle, %0, %23 : vector<1x256xi32>
    %c14_i32_11 = arith.constant 14 : i32
    %25 = vector.broadcast %c14_i32_11 : i32 to vector<1x256xi32>
    %26 = arith.cmpi sle, %0, %25 : vector<1x256xi32>
    %c14_i32_12 = arith.constant 14 : i32
    %27 = vector.broadcast %c14_i32_12 : i32 to vector<1x256xi32>
    %28 = arith.cmpi sle, %1, %27 : vector<1x256xi32>
    %29 = arith.andi %26, %28 : vector<1x256xi1>
    %c0_13 = arith.constant 0 : index
    %c0_14 = arith.constant 0 : index
    %c0_15 = arith.constant 0 : index
    %30 = vector.load %arg0[%c0_13, %c0_14, %c0_15] : memref<2x8x256xf32, #tpu.memory_space<vmem>>, vector<1x8x256xf32>
    %31 = vector.shape_cast %30 : vector<1x8x256xf32> to vector<8x256xf32>
    %c1 = arith.constant 1 : index
    %c0_16 = arith.constant 0 : index
    %c0_17 = arith.constant 0 : index
    %32 = vector.load %arg0[%c1, %c0_16, %c0_17] : memref<2x8x256xf32, #tpu.memory_space<vmem>>, vector<1x8x256xf32>
    %33 = vector.shape_cast %32 : vector<1x8x256xf32> to vector<8x256xf32>
    %c0_18 = arith.constant 0 : index
    %c0_19 = arith.constant 0 : index
    %34 = vector.load %arg3[%c0_18, %c0_19] : memref<8x72xbf16, #tpu.memory_space<vmem>>, vector<8x72xbf16>
    %c17_i32 = arith.constant 17 : i32
    %35 = tpu.dynamic_rotate %31 by %c17_i32 dim 1 : vector<8x256xf32>, i32 -> vector<8x256xf32>
    %cst = arith.constant 0.000000e+00 : f32
    %36 = vector.shape_cast %6 : vector<1x256xi1> to vector<1x256xi1>
    %37 = vector.broadcast %36 : vector<1x256xi1> to vector<8x256xi1>
    %38 = vector.broadcast %cst : f32 to vector<8x256xf32>
    %39 = arith.select %37, %35, %38 : vector<8x256xi1>, vector<8x256xf32>
    %c16_i32 = arith.constant 16 : i32
    %40 = tpu.dynamic_rotate %31 by %c16_i32 dim 1 : vector<8x256xf32>, i32 -> vector<8x256xf32>
    %cst_20 = arith.constant 0.000000e+00 : f32
    %41 = vector.shape_cast %8 : vector<1x256xi1> to vector<1x256xi1>
    %42 = vector.broadcast %41 : vector<1x256xi1> to vector<8x256xi1>
    %43 = vector.broadcast %cst_20 : f32 to vector<8x256xf32>
    %44 = arith.select %42, %40, %43 : vector<8x256xi1>, vector<8x256xf32>
    %c15_i32 = arith.constant 15 : i32
    %45 = tpu.dynamic_rotate %31 by %c15_i32 dim 1 : vector<8x256xf32>, i32 -> vector<8x256xf32>
    %cst_21 = arith.constant 0.000000e+00 : f32
    %46 = vector.shape_cast %13 : vector<1x256xi1> to vector<1x256xi1>
    %47 = vector.broadcast %46 : vector<1x256xi1> to vector<8x256xi1>
    %48 = vector.broadcast %cst_21 : f32 to vector<8x256xf32>
    %49 = arith.select %47, %45, %48 : vector<8x256xi1>, vector<8x256xf32>
    %c1_i32_22 = arith.constant 1 : i32
    %50 = tpu.dynamic_rotate %31 by %c1_i32_22 dim 1 : vector<8x256xf32>, i32 -> vector<8x256xf32>
    %cst_23 = arith.constant 0.000000e+00 : f32
    %51 = vector.shape_cast %15 : vector<1x256xi1> to vector<1x256xi1>
    %52 = vector.broadcast %51 : vector<1x256xi1> to vector<8x256xi1>
    %53 = vector.broadcast %cst_23 : f32 to vector<8x256xf32>
    %54 = arith.select %52, %50, %53 : vector<8x256xi1>, vector<8x256xf32>
    %c255_i32 = arith.constant 255 : i32
    %55 = tpu.dynamic_rotate %31 by %c255_i32 dim 1 : vector<8x256xf32>, i32 -> vector<8x256xf32>
    %cst_24 = arith.constant 0.000000e+00 : f32
    %56 = vector.shape_cast %17 : vector<1x256xi1> to vector<1x256xi1>
    %57 = vector.broadcast %56 : vector<1x256xi1> to vector<8x256xi1>
    %58 = vector.broadcast %cst_24 : f32 to vector<8x256xf32>
    %59 = arith.select %57, %55, %58 : vector<8x256xi1>, vector<8x256xf32>
    %c241_i32 = arith.constant 241 : i32
    %60 = tpu.dynamic_rotate %31 by %c241_i32 dim 1 : vector<8x256xf32>, i32 -> vector<8x256xf32>
    %cst_25 = arith.constant 0.000000e+00 : f32
    %61 = vector.shape_cast %22 : vector<1x256xi1> to vector<1x256xi1>
    %62 = vector.broadcast %61 : vector<1x256xi1> to vector<8x256xi1>
    %63 = vector.broadcast %cst_25 : f32 to vector<8x256xf32>
    %64 = arith.select %62, %60, %63 : vector<8x256xi1>, vector<8x256xf32>
    %c240_i32 = arith.constant 240 : i32
    %65 = tpu.dynamic_rotate %31 by %c240_i32 dim 1 : vector<8x256xf32>, i32 -> vector<8x256xf32>
    %cst_26 = arith.constant 0.000000e+00 : f32
    %66 = vector.shape_cast %24 : vector<1x256xi1> to vector<1x256xi1>
    %67 = vector.broadcast %66 : vector<1x256xi1> to vector<8x256xi1>
    %68 = vector.broadcast %cst_26 : f32 to vector<8x256xf32>
    %69 = arith.select %67, %65, %68 : vector<8x256xi1>, vector<8x256xf32>
    %c239_i32 = arith.constant 239 : i32
    %70 = tpu.dynamic_rotate %31 by %c239_i32 dim 1 : vector<8x256xf32>, i32 -> vector<8x256xf32>
    %cst_27 = arith.constant 0.000000e+00 : f32
    %71 = vector.shape_cast %29 : vector<1x256xi1> to vector<1x256xi1>
    %72 = vector.broadcast %71 : vector<1x256xi1> to vector<8x256xi1>
    %73 = vector.broadcast %cst_27 : f32 to vector<8x256xf32>
    %74 = arith.select %72, %70, %73 : vector<8x256xi1>, vector<8x256xf32>
    %75 = tpu.concatenate %39, %44, %49, %54, %31, %59, %64, %69, %74 in 0 : vector<8x256xf32>, vector<8x256xf32>, vector<8x256xf32>, vector<8x256xf32>, vector<8x256xf32>, vector<8x256xf32>, vector<8x256xf32>, vector<8x256xf32>, vector<8x256xf32> -> vector<72x256xf32>
    %76 = arith.truncf %75 : vector<72x256xf32> to vector<72x256xbf16>
    %cst_28 = arith.constant dense<0.000000e+00> : vector<8x256xf32>
    %77 = tpu.matmul %34, %76, %cst_28 {dimension_numbers = #tpu.dot_dimension_numbers<[1], [0], [0], [1], [0, 0, 1, 1], [], []>} : vector<8x72xbf16>, vector<72x256xbf16>, vector<8x256xf32> -> vector<8x256xf32>
    %c17_i32_29 = arith.constant 17 : i32
    %78 = tpu.dynamic_rotate %33 by %c17_i32_29 dim 1 : vector<8x256xf32>, i32 -> vector<8x256xf32>
    %cst_30 = arith.constant 0.000000e+00 : f32
    %79 = vector.shape_cast %6 : vector<1x256xi1> to vector<1x256xi1>
    %80 = vector.broadcast %79 : vector<1x256xi1> to vector<8x256xi1>
    %81 = vector.broadcast %cst_30 : f32 to vector<8x256xf32>
    %82 = arith.select %80, %78, %81 : vector<8x256xi1>, vector<8x256xf32>
    %c16_i32_31 = arith.constant 16 : i32
    %83 = tpu.dynamic_rotate %33 by %c16_i32_31 dim 1 : vector<8x256xf32>, i32 -> vector<8x256xf32>
    %cst_32 = arith.constant 0.000000e+00 : f32
    %84 = vector.shape_cast %8 : vector<1x256xi1> to vector<1x256xi1>
    %85 = vector.broadcast %84 : vector<1x256xi1> to vector<8x256xi1>
    %86 = vector.broadcast %cst_32 : f32 to vector<8x256xf32>
    %87 = arith.select %85, %83, %86 : vector<8x256xi1>, vector<8x256xf32>
    %c15_i32_33 = arith.constant 15 : i32
    %88 = tpu.dynamic_rotate %33 by %c15_i32_33 dim 1 : vector<8x256xf32>, i32 -> vector<8x256xf32>
    %cst_34 = arith.constant 0.000000e+00 : f32
    %89 = vector.shape_cast %13 : vector<1x256xi1> to vector<1x256xi1>
    %90 = vector.broadcast %89 : vector<1x256xi1> to vector<8x256xi1>
    %91 = vector.broadcast %cst_34 : f32 to vector<8x256xf32>
    %92 = arith.select %90, %88, %91 : vector<8x256xi1>, vector<8x256xf32>
    %c1_i32_35 = arith.constant 1 : i32
    %93 = tpu.dynamic_rotate %33 by %c1_i32_35 dim 1 : vector<8x256xf32>, i32 -> vector<8x256xf32>
    %cst_36 = arith.constant 0.000000e+00 : f32
    %94 = vector.shape_cast %15 : vector<1x256xi1> to vector<1x256xi1>
    %95 = vector.broadcast %94 : vector<1x256xi1> to vector<8x256xi1>
    %96 = vector.broadcast %cst_36 : f32 to vector<8x256xf32>
    %97 = arith.select %95, %93, %96 : vector<8x256xi1>, vector<8x256xf32>
    %c255_i32_37 = arith.constant 255 : i32
    %98 = tpu.dynamic_rotate %33 by %c255_i32_37 dim 1 : vector<8x256xf32>, i32 -> vector<8x256xf32>
    %cst_38 = arith.constant 0.000000e+00 : f32
    %99 = vector.shape_cast %17 : vector<1x256xi1> to vector<1x256xi1>
    %100 = vector.broadcast %99 : vector<1x256xi1> to vector<8x256xi1>
    %101 = vector.broadcast %cst_38 : f32 to vector<8x256xf32>
    %102 = arith.select %100, %98, %101 : vector<8x256xi1>, vector<8x256xf32>
    %c241_i32_39 = arith.constant 241 : i32
    %103 = tpu.dynamic_rotate %33 by %c241_i32_39 dim 1 : vector<8x256xf32>, i32 -> vector<8x256xf32>
    %cst_40 = arith.constant 0.000000e+00 : f32
    %104 = vector.shape_cast %22 : vector<1x256xi1> to vector<1x256xi1>
    %105 = vector.broadcast %104 : vector<1x256xi1> to vector<8x256xi1>
    %106 = vector.broadcast %cst_40 : f32 to vector<8x256xf32>
    %107 = arith.select %105, %103, %106 : vector<8x256xi1>, vector<8x256xf32>
    %c240_i32_41 = arith.constant 240 : i32
    %108 = tpu.dynamic_rotate %33 by %c240_i32_41 dim 1 : vector<8x256xf32>, i32 -> vector<8x256xf32>
    %cst_42 = arith.constant 0.000000e+00 : f32
    %109 = vector.shape_cast %24 : vector<1x256xi1> to vector<1x256xi1>
    %110 = vector.broadcast %109 : vector<1x256xi1> to vector<8x256xi1>
    %111 = vector.broadcast %cst_42 : f32 to vector<8x256xf32>
    %112 = arith.select %110, %108, %111 : vector<8x256xi1>, vector<8x256xf32>
    %c239_i32_43 = arith.constant 239 : i32
    %113 = tpu.dynamic_rotate %33 by %c239_i32_43 dim 1 : vector<8x256xf32>, i32 -> vector<8x256xf32>
    %cst_44 = arith.constant 0.000000e+00 : f32
    %114 = vector.shape_cast %29 : vector<1x256xi1> to vector<1x256xi1>
    %115 = vector.broadcast %114 : vector<1x256xi1> to vector<8x256xi1>
    %116 = vector.broadcast %cst_44 : f32 to vector<8x256xf32>
    %117 = arith.select %115, %113, %116 : vector<8x256xi1>, vector<8x256xf32>
    %118 = tpu.concatenate %82, %87, %92, %97, %33, %102, %107, %112, %117 in 0 : vector<8x256xf32>, vector<8x256xf32>, vector<8x256xf32>, vector<8x256xf32>, vector<8x256xf32>, vector<8x256xf32>, vector<8x256xf32>, vector<8x256xf32>, vector<8x256xf32> -> vector<72x256xf32>
    %119 = arith.truncf %118 : vector<72x256xf32> to vector<72x256xbf16>
    %cst_45 = arith.constant dense<0.000000e+00> : vector<8x256xf32>
    %120 = tpu.matmul %34, %119, %cst_45 {dimension_numbers = #tpu.dot_dimension_numbers<[1], [0], [0], [1], [0, 0, 1, 1], [], []>} : vector<8x72xbf16>, vector<72x256xbf16>, vector<8x256xf32> -> vector<8x256xf32>
    %cst_46 = arith.constant dense<0.000000e+00> : vector<8xf32>
    %121 = vector.multi_reduction <add>, %77, %cst_46 [1] : vector<8x256xf32> to vector<8xf32>
    %122 = vector.shape_cast %121 : vector<8xf32> to vector<8x1xf32>
    %cst_47 = arith.constant 0.000000e+00 : f32
    %123 = vector.broadcast %cst_47 : f32 to vector<8x1xf32>
    %124 = arith.addf %123, %122 : vector<8x1xf32>
    %cst_48 = arith.constant dense<0.000000e+00> : vector<8xf32>
    %125 = vector.multi_reduction <add>, %120, %cst_48 [1] : vector<8x256xf32> to vector<8xf32>
    %126 = vector.shape_cast %125 : vector<8xf32> to vector<8x1xf32>
    %127 = arith.addf %124, %126 : vector<8x1xf32>
    %cst_49 = arith.constant 5.120000e+02 : f32
    %128 = vector.broadcast %cst_49 : f32 to vector<8x1xf32>
    %129 = arith.divf %127, %128 : vector<8x1xf32>
    %130 = vector.broadcast %129 : vector<8x1xf32> to vector<8x256xf32>
    %131 = arith.subf %77, %130 : vector<8x256xf32>
    %132 = vector.broadcast %129 : vector<8x1xf32> to vector<8x256xf32>
    %133 = arith.subf %120, %132 : vector<8x256xf32>
    %134 = arith.mulf %131, %131 : vector<8x256xf32>
    %cst_50 = arith.constant dense<0.000000e+00> : vector<8xf32>
    %135 = vector.multi_reduction <add>, %134, %cst_50 [1] : vector<8x256xf32> to vector<8xf32>
    %136 = vector.shape_cast %135 : vector<8xf32> to vector<8x1xf32>
    %cst_51 = arith.constant 0.000000e+00 : f32
    %137 = vector.broadcast %cst_51 : f32 to vector<8x1xf32>
    %138 = arith.addf %137, %136 : vector<8x1xf32>
    %139 = arith.mulf %133, %133 : vector<8x256xf32>
    %cst_52 = arith.constant dense<0.000000e+00> : vector<8xf32>
    %140 = vector.multi_reduction <add>, %139, %cst_52 [1] : vector<8x256xf32> to vector<8xf32>
    %141 = vector.shape_cast %140 : vector<8xf32> to vector<8x1xf32>
    %142 = arith.addf %138, %141 : vector<8x1xf32>
    %cst_53 = arith.constant 5.120000e+02 : f32
    %143 = vector.broadcast %cst_53 : f32 to vector<8x1xf32>
    %144 = arith.divf %142, %143 : vector<8x1xf32>
    %c0_54 = arith.constant 0 : index
    %c0_55 = arith.constant 0 : index
    %145 = vector.load %arg4[%c0_54, %c0_55] : memref<8x1xf32, #tpu.memory_space<vmem>>, vector<8x1xf32>
    %cst_56 = arith.constant 9.99999974E-6 : f32
    %146 = vector.broadcast %cst_56 : f32 to vector<8x1xf32>
    %147 = arith.addf %144, %146 : vector<8x1xf32>
    %148 = math.rsqrt %147 : vector<8x1xf32>
    %149 = arith.mulf %145, %148 : vector<8x1xf32>
    %c0_57 = arith.constant 0 : index
    %c0_58 = arith.constant 0 : index
    %150 = vector.load %arg5[%c0_57, %c0_58] : memref<8x1xf32, #tpu.memory_space<vmem>>, vector<8x1xf32>
    %151 = vector.broadcast %149 : vector<8x1xf32> to vector<8x256xf32>
    %152 = arith.mulf %131, %151 : vector<8x256xf32>
    %153 = vector.broadcast %150 : vector<8x1xf32> to vector<8x256xf32>
    %154 = arith.addf %152, %153 : vector<8x256xf32>
    %155 = vector.broadcast %149 : vector<8x1xf32> to vector<8x256xf32>
    %156 = arith.mulf %133, %155 : vector<8x256xf32>
    %157 = vector.broadcast %150 : vector<8x1xf32> to vector<8x256xf32>
    %158 = arith.addf %156, %157 : vector<8x256xf32>
    %cst_59 = arith.constant 0.000000e+00 : f32
    %159 = vector.broadcast %cst_59 : f32 to vector<8x256xf32>
    %160 = arith.maximumf %154, %159 : vector<8x256xf32>
    %cst_60 = arith.constant 0.000000e+00 : f32
    %161 = vector.broadcast %cst_60 : f32 to vector<8x256xf32>
    %162 = arith.maximumf %158, %161 : vector<8x256xf32>
    %c0_61 = arith.constant 0 : index
    %c0_62 = arith.constant 0 : index
    %163 = vector.load %arg6[%c0_61, %c0_62] : memref<8x72xbf16, #tpu.memory_space<vmem>>, vector<8x72xbf16>
    %c17_i32_63 = arith.constant 17 : i32
    %164 = tpu.dynamic_rotate %160 by %c17_i32_63 dim 1 : vector<8x256xf32>, i32 -> vector<8x256xf32>
    %cst_64 = arith.constant 0.000000e+00 : f32
    %165 = vector.shape_cast %6 : vector<1x256xi1> to vector<1x256xi1>
    %166 = vector.broadcast %165 : vector<1x256xi1> to vector<8x256xi1>
    %167 = vector.broadcast %cst_64 : f32 to vector<8x256xf32>
    %168 = arith.select %166, %164, %167 : vector<8x256xi1>, vector<8x256xf32>
    %c16_i32_65 = arith.constant 16 : i32
    %169 = tpu.dynamic_rotate %160 by %c16_i32_65 dim 1 : vector<8x256xf32>, i32 -> vector<8x256xf32>
    %cst_66 = arith.constant 0.000000e+00 : f32
    %170 = vector.shape_cast %8 : vector<1x256xi1> to vector<1x256xi1>
    %171 = vector.broadcast %170 : vector<1x256xi1> to vector<8x256xi1>
    %172 = vector.broadcast %cst_66 : f32 to vector<8x256xf32>
    %173 = arith.select %171, %169, %172 : vector<8x256xi1>, vector<8x256xf32>
    %c15_i32_67 = arith.constant 15 : i32
    %174 = tpu.dynamic_rotate %160 by %c15_i32_67 dim 1 : vector<8x256xf32>, i32 -> vector<8x256xf32>
    %cst_68 = arith.constant 0.000000e+00 : f32
    %175 = vector.shape_cast %13 : vector<1x256xi1> to vector<1x256xi1>
    %176 = vector.broadcast %175 : vector<1x256xi1> to vector<8x256xi1>
    %177 = vector.broadcast %cst_68 : f32 to vector<8x256xf32>
    %178 = arith.select %176, %174, %177 : vector<8x256xi1>, vector<8x256xf32>
    %c1_i32_69 = arith.constant 1 : i32
    %179 = tpu.dynamic_rotate %160 by %c1_i32_69 dim 1 : vector<8x256xf32>, i32 -> vector<8x256xf32>
    %cst_70 = arith.constant 0.000000e+00 : f32
    %180 = vector.shape_cast %15 : vector<1x256xi1> to vector<1x256xi1>
    %181 = vector.broadcast %180 : vector<1x256xi1> to vector<8x256xi1>
    %182 = vector.broadcast %cst_70 : f32 to vector<8x256xf32>
    %183 = arith.select %181, %179, %182 : vector<8x256xi1>, vector<8x256xf32>
    %c255_i32_71 = arith.constant 255 : i32
    %184 = tpu.dynamic_rotate %160 by %c255_i32_71 dim 1 : vector<8x256xf32>, i32 -> vector<8x256xf32>
    %cst_72 = arith.constant 0.000000e+00 : f32
    %185 = vector.shape_cast %17 : vector<1x256xi1> to vector<1x256xi1>
    %186 = vector.broadcast %185 : vector<1x256xi1> to vector<8x256xi1>
    %187 = vector.broadcast %cst_72 : f32 to vector<8x256xf32>
    %188 = arith.select %186, %184, %187 : vector<8x256xi1>, vector<8x256xf32>
    %c241_i32_73 = arith.constant 241 : i32
    %189 = tpu.dynamic_rotate %160 by %c241_i32_73 dim 1 : vector<8x256xf32>, i32 -> vector<8x256xf32>
    %cst_74 = arith.constant 0.000000e+00 : f32
    %190 = vector.shape_cast %22 : vector<1x256xi1> to vector<1x256xi1>
    %191 = vector.broadcast %190 : vector<1x256xi1> to vector<8x256xi1>
    %192 = vector.broadcast %cst_74 : f32 to vector<8x256xf32>
    %193 = arith.select %191, %189, %192 : vector<8x256xi1>, vector<8x256xf32>
    %c240_i32_75 = arith.constant 240 : i32
    %194 = tpu.dynamic_rotate %160 by %c240_i32_75 dim 1 : vector<8x256xf32>, i32 -> vector<8x256xf32>
    %cst_76 = arith.constant 0.000000e+00 : f32
    %195 = vector.shape_cast %24 : vector<1x256xi1> to vector<1x256xi1>
    %196 = vector.broadcast %195 : vector<1x256xi1> to vector<8x256xi1>
    %197 = vector.broadcast %cst_76 : f32 to vector<8x256xf32>
    %198 = arith.select %196, %194, %197 : vector<8x256xi1>, vector<8x256xf32>
    %c239_i32_77 = arith.constant 239 : i32
    %199 = tpu.dynamic_rotate %160 by %c239_i32_77 dim 1 : vector<8x256xf32>, i32 -> vector<8x256xf32>
    %cst_78 = arith.constant 0.000000e+00 : f32
    %200 = vector.shape_cast %29 : vector<1x256xi1> to vector<1x256xi1>
    %201 = vector.broadcast %200 : vector<1x256xi1> to vector<8x256xi1>
    %202 = vector.broadcast %cst_78 : f32 to vector<8x256xf32>
    %203 = arith.select %201, %199, %202 : vector<8x256xi1>, vector<8x256xf32>
    %204 = tpu.concatenate %168, %173, %178, %183, %160, %188, %193, %198, %203 in 0 : vector<8x256xf32>, vector<8x256xf32>, vector<8x256xf32>, vector<8x256xf32>, vector<8x256xf32>, vector<8x256xf32>, vector<8x256xf32>, vector<8x256xf32>, vector<8x256xf32> -> vector<72x256xf32>
    %205 = arith.truncf %204 : vector<72x256xf32> to vector<72x256xbf16>
    %cst_79 = arith.constant dense<0.000000e+00> : vector<8x256xf32>
    %206 = tpu.matmul %163, %205, %cst_79 {dimension_numbers = #tpu.dot_dimension_numbers<[1], [0], [0], [1], [0, 0, 1, 1], [], []>} : vector<8x72xbf16>, vector<72x256xbf16>, vector<8x256xf32> -> vector<8x256xf32>
    %c17_i32_80 = arith.constant 17 : i32
    %207 = tpu.dynamic_rotate %162 by %c17_i32_80 dim 1 : vector<8x256xf32>, i32 -> vector<8x256xf32>
    %cst_81 = arith.constant 0.000000e+00 : f32
    %208 = vector.shape_cast %6 : vector<1x256xi1> to vector<1x256xi1>
    %209 = vector.broadcast %208 : vector<1x256xi1> to vector<8x256xi1>
    %210 = vector.broadcast %cst_81 : f32 to vector<8x256xf32>
    %211 = arith.select %209, %207, %210 : vector<8x256xi1>, vector<8x256xf32>
    %c16_i32_82 = arith.constant 16 : i32
    %212 = tpu.dynamic_rotate %162 by %c16_i32_82 dim 1 : vector<8x256xf32>, i32 -> vector<8x256xf32>
    %cst_83 = arith.constant 0.000000e+00 : f32
    %213 = vector.shape_cast %8 : vector<1x256xi1> to vector<1x256xi1>
    %214 = vector.broadcast %213 : vector<1x256xi1> to vector<8x256xi1>
    %215 = vector.broadcast %cst_83 : f32 to vector<8x256xf32>
    %216 = arith.select %214, %212, %215 : vector<8x256xi1>, vector<8x256xf32>
    %c15_i32_84 = arith.constant 15 : i32
    %217 = tpu.dynamic_rotate %162 by %c15_i32_84 dim 1 : vector<8x256xf32>, i32 -> vector<8x256xf32>
    %cst_85 = arith.constant 0.000000e+00 : f32
    %218 = vector.shape_cast %13 : vector<1x256xi1> to vector<1x256xi1>
    %219 = vector.broadcast %218 : vector<1x256xi1> to vector<8x256xi1>
    %220 = vector.broadcast %cst_85 : f32 to vector<8x256xf32>
    %221 = arith.select %219, %217, %220 : vector<8x256xi1>, vector<8x256xf32>
    %c1_i32_86 = arith.constant 1 : i32
    %222 = tpu.dynamic_rotate %162 by %c1_i32_86 dim 1 : vector<8x256xf32>, i32 -> vector<8x256xf32>
    %cst_87 = arith.constant 0.000000e+00 : f32
    %223 = vector.shape_cast %15 : vector<1x256xi1> to vector<1x256xi1>
    %224 = vector.broadcast %223 : vector<1x256xi1> to vector<8x256xi1>
    %225 = vector.broadcast %cst_87 : f32 to vector<8x256xf32>
    %226 = arith.select %224, %222, %225 : vector<8x256xi1>, vector<8x256xf32>
    %c255_i32_88 = arith.constant 255 : i32
    %227 = tpu.dynamic_rotate %162 by %c255_i32_88 dim 1 : vector<8x256xf32>, i32 -> vector<8x256xf32>
    %cst_89 = arith.constant 0.000000e+00 : f32
    %228 = vector.shape_cast %17 : vector<1x256xi1> to vector<1x256xi1>
    %229 = vector.broadcast %228 : vector<1x256xi1> to vector<8x256xi1>
    %230 = vector.broadcast %cst_89 : f32 to vector<8x256xf32>
    %231 = arith.select %229, %227, %230 : vector<8x256xi1>, vector<8x256xf32>
    %c241_i32_90 = arith.constant 241 : i32
    %232 = tpu.dynamic_rotate %162 by %c241_i32_90 dim 1 : vector<8x256xf32>, i32 -> vector<8x256xf32>
    %cst_91 = arith.constant 0.000000e+00 : f32
    %233 = vector.shape_cast %22 : vector<1x256xi1> to vector<1x256xi1>
    %234 = vector.broadcast %233 : vector<1x256xi1> to vector<8x256xi1>
    %235 = vector.broadcast %cst_91 : f32 to vector<8x256xf32>
    %236 = arith.select %234, %232, %235 : vector<8x256xi1>, vector<8x256xf32>
    %c240_i32_92 = arith.constant 240 : i32
    %237 = tpu.dynamic_rotate %162 by %c240_i32_92 dim 1 : vector<8x256xf32>, i32 -> vector<8x256xf32>
    %cst_93 = arith.constant 0.000000e+00 : f32
    %238 = vector.shape_cast %24 : vector<1x256xi1> to vector<1x256xi1>
    %239 = vector.broadcast %238 : vector<1x256xi1> to vector<8x256xi1>
    %240 = vector.broadcast %cst_93 : f32 to vector<8x256xf32>
    %241 = arith.select %239, %237, %240 : vector<8x256xi1>, vector<8x256xf32>
    %c239_i32_94 = arith.constant 239 : i32
    %242 = tpu.dynamic_rotate %162 by %c239_i32_94 dim 1 : vector<8x256xf32>, i32 -> vector<8x256xf32>
    %cst_95 = arith.constant 0.000000e+00 : f32
    %243 = vector.shape_cast %29 : vector<1x256xi1> to vector<1x256xi1>
    %244 = vector.broadcast %243 : vector<1x256xi1> to vector<8x256xi1>
    %245 = vector.broadcast %cst_95 : f32 to vector<8x256xf32>
    %246 = arith.select %244, %242, %245 : vector<8x256xi1>, vector<8x256xf32>
    %247 = tpu.concatenate %211, %216, %221, %226, %162, %231, %236, %241, %246 in 0 : vector<8x256xf32>, vector<8x256xf32>, vector<8x256xf32>, vector<8x256xf32>, vector<8x256xf32>, vector<8x256xf32>, vector<8x256xf32>, vector<8x256xf32>, vector<8x256xf32> -> vector<72x256xf32>
    %248 = arith.truncf %247 : vector<72x256xf32> to vector<72x256xbf16>
    %cst_96 = arith.constant dense<0.000000e+00> : vector<8x256xf32>
    %249 = tpu.matmul %163, %248, %cst_96 {dimension_numbers = #tpu.dot_dimension_numbers<[1], [0], [0], [1], [0, 0, 1, 1], [], []>} : vector<8x72xbf16>, vector<72x256xbf16>, vector<8x256xf32> -> vector<8x256xf32>
    %cst_97 = arith.constant dense<0.000000e+00> : vector<8xf32>
    %250 = vector.multi_reduction <add>, %206, %cst_97 [1] : vector<8x256xf32> to vector<8xf32>
    %251 = vector.shape_cast %250 : vector<8xf32> to vector<8x1xf32>
    %cst_98 = arith.constant 0.000000e+00 : f32
    %252 = vector.broadcast %cst_98 : f32 to vector<8x1xf32>
    %253 = arith.addf %252, %251 : vector<8x1xf32>
    %cst_99 = arith.constant dense<0.000000e+00> : vector<8xf32>
    %254 = vector.multi_reduction <add>, %249, %cst_99 [1] : vector<8x256xf32> to vector<8xf32>
    %255 = vector.shape_cast %254 : vector<8xf32> to vector<8x1xf32>
    %256 = arith.addf %253, %255 : vector<8x1xf32>
    %cst_100 = arith.constant 5.120000e+02 : f32
    %257 = vector.broadcast %cst_100 : f32 to vector<8x1xf32>
    %258 = arith.divf %256, %257 : vector<8x1xf32>
    %259 = vector.broadcast %258 : vector<8x1xf32> to vector<8x256xf32>
    %260 = arith.subf %206, %259 : vector<8x256xf32>
    %261 = vector.broadcast %258 : vector<8x1xf32> to vector<8x256xf32>
    %262 = arith.subf %249, %261 : vector<8x256xf32>
    %263 = arith.mulf %260, %260 : vector<8x256xf32>
    %cst_101 = arith.constant dense<0.000000e+00> : vector<8xf32>
    %264 = vector.multi_reduction <add>, %263, %cst_101 [1] : vector<8x256xf32> to vector<8xf32>
    %265 = vector.shape_cast %264 : vector<8xf32> to vector<8x1xf32>
    %cst_102 = arith.constant 0.000000e+00 : f32
    %266 = vector.broadcast %cst_102 : f32 to vector<8x1xf32>
    %267 = arith.addf %266, %265 : vector<8x1xf32>
    %268 = arith.mulf %262, %262 : vector<8x256xf32>
    %cst_103 = arith.constant dense<0.000000e+00> : vector<8xf32>
    %269 = vector.multi_reduction <add>, %268, %cst_103 [1] : vector<8x256xf32> to vector<8xf32>
    %270 = vector.shape_cast %269 : vector<8xf32> to vector<8x1xf32>
    %271 = arith.addf %267, %270 : vector<8x1xf32>
    %cst_104 = arith.constant 5.120000e+02 : f32
    %272 = vector.broadcast %cst_104 : f32 to vector<8x1xf32>
    %273 = arith.divf %271, %272 : vector<8x1xf32>
    %c0_105 = arith.constant 0 : index
    %c0_106 = arith.constant 0 : index
    %274 = vector.load %arg7[%c0_105, %c0_106] : memref<8x1xf32, #tpu.memory_space<vmem>>, vector<8x1xf32>
    %cst_107 = arith.constant 9.99999974E-6 : f32
    %275 = vector.broadcast %cst_107 : f32 to vector<8x1xf32>
    %276 = arith.addf %273, %275 : vector<8x1xf32>
    %277 = math.rsqrt %276 : vector<8x1xf32>
    %278 = arith.mulf %274, %277 : vector<8x1xf32>
    %c0_108 = arith.constant 0 : index
    %c0_109 = arith.constant 0 : index
    %279 = vector.load %arg8[%c0_108, %c0_109] : memref<8x1xf32, #tpu.memory_space<vmem>>, vector<8x1xf32>
    %280 = vector.broadcast %278 : vector<8x1xf32> to vector<8x256xf32>
    %281 = arith.mulf %260, %280 : vector<8x256xf32>
    %282 = vector.broadcast %279 : vector<8x1xf32> to vector<8x256xf32>
    %283 = arith.addf %281, %282 : vector<8x256xf32>
    %284 = vector.broadcast %278 : vector<8x1xf32> to vector<8x256xf32>
    %285 = arith.mulf %262, %284 : vector<8x256xf32>
    %286 = vector.broadcast %279 : vector<8x1xf32> to vector<8x256xf32>
    %287 = arith.addf %285, %286 : vector<8x256xf32>
    %288 = arith.addf %283, %31 : vector<8x256xf32>
    %cst_110 = arith.constant 0.000000e+00 : f32
    %289 = vector.broadcast %cst_110 : f32 to vector<8x256xf32>
    %290 = arith.maximumf %288, %289 : vector<8x256xf32>
    %c0_111 = arith.constant 0 : index
    %c0_112 = arith.constant 0 : index
    %c0_113 = arith.constant 0 : index
    %291 = vector.load %arg9[%c0_111, %c0_112, %c0_113] : memref<2x8x256xf32, #tpu.memory_space<vmem>>, vector<1x8x256xf32>
    %292 = vector.shape_cast %291 : vector<1x8x256xf32> to vector<8x256xf32>
    %293 = vector.shape_cast %290 : vector<8x256xf32> to vector<1x8x256xf32>
    tpu.vector_store %arg9[%c0_111, %c0_112, %c0_113], %293 {strides = array<i32>} : memref<2x8x256xf32, #tpu.memory_space<vmem>>, vector<1x8x256xf32>,
    %294 = arith.addf %287, %33 : vector<8x256xf32>
    %cst_114 = arith.constant 0.000000e+00 : f32
    %295 = vector.broadcast %cst_114 : f32 to vector<8x256xf32>
    %296 = arith.maximumf %294, %295 : vector<8x256xf32>
    %c1_115 = arith.constant 1 : index
    %c0_116 = arith.constant 0 : index
    %c0_117 = arith.constant 0 : index
    %297 = vector.load %arg9[%c1_115, %c0_116, %c0_117] : memref<2x8x256xf32, #tpu.memory_space<vmem>>, vector<1x8x256xf32>
    %298 = vector.shape_cast %297 : vector<1x8x256xf32> to vector<8x256xf32>
    %299 = vector.shape_cast %296 : vector<8x256xf32> to vector<1x8x256xf32>
    tpu.vector_store %arg9[%c1_115, %c0_116, %c0_117], %299 {strides = array<i32>} : memref<2x8x256xf32, #tpu.memory_space<vmem>>, vector<1x8x256xf32>,
    return
  }
}

</mosaic_0001>

<bundles_post_ra>
// kernel: residual_block_pallas.1
= control target key start
LH: loop header
LB: loop body
LE: loop exit
PB: predicated region body
PF: predicated region fallthrough
CT: control target
= control target key end

     0   :  { %v1048_v3 = vmov 0   ;;  %s1049_s17 = smov 17   ;;  %s1050_s18 = smov 16   ;;  %v53_v9 = vlaneseq  ;;  %s1674_s0 = inlined_call_operand.vmem [shape: f32[2,8,256], index: 0, kind: input, shape index: {}]   ;;  %s1675_s1 = inlined_call_operand.vmem [shape: s32[1,256], index: 1, kind: input, shape index: {}]   ;;  %s1676_s2 = inlined_call_operand.vmem [shape: s32[1,256], index: 2, kind: input, shape index: {}]   ;;  %s1677_s3 = inlined_call_operand.vmem [shape: bf16[8,72], index: 3, kind: input, shape index: {}]   ;;  %s1678_s5 = inlined_call_operand.vmem [shape: f32[8,1], index: 5, kind: input, shape index: {}]   ;;  %s1679_s4 = inlined_call_operand.vmem [shape: f32[8,1], index: 4, kind: input, shape index: {}]   ;;  %s1680_s6 = inlined_call_operand.vmem [shape: bf16[8,72], index: 6, kind: input, shape index: {}]   ;;  %s1681_s8 = inlined_call_operand.vmem [shape: f32[8,1], index: 8, kind: input, shape index: {}]   ;;  %s1682_s7 = inlined_call_operand.vmem [shape: f32[8,1], index: 7, kind: input, shape index: {}]   ;;  %s1683_s9 = inlined_call_operand.vmem [shape: f32[2,8,256], index: 9, kind: output, shape index: {}]  }
   0x1   :  { %v1111_v0 = vld [vmem:[%s1674_s0 + $0x10] sm:$0xff]  ;;  %v1116_v1 = vld [vmem:[%s1674_s0 + $0x18] sm:$0xff]  ;;  %v1121_v2 = vld [vmem:[%s1674_s0] sm:$0xff]  ;;  %264 = vmatprep.mubr.bf16.mxu0 %v1048_v3  ;;  %385 = vmatprep.mubr.bf16.mxu1 %v1048_v3  ;;  %s1051_s19 = smov 1   ;;  %s1052_s20 = smov 15  }
   0x2   :  { %v888_v4 = vpack.i.bf16 %v1116_v1, %v1111_v0  ;;  %v1130_v5 = vld [vmem:[%s1674_s0 + $0x8] sm:$0xff]  ;;  %958 = vset.pattern.permute.xlu1 %v1048_v3  ;;  %959 = vset.pattern.permute.xlu0 %v1048_v3  ;;  %s1053_s21 = smov 127   ;;  %s1054_s22 = smov 112   ;;  %v1155_v7 = vld [vmem:[%s1675_s1] sm:$0x3]  ;;  %v60_v10 = vshrl.u32 %v53_v9, 7 }
   0x3   :  { %v878_v6 = vpack.i.bf16 %v1130_v5, %v1121_v2  ;;  %s1055_s23 = smov 113   ;;  %s1056_s24 = smov 111   ;;  %v1160_v8 = vld [vmem:[%s1676_s2] sm:$0x3]  ;;  %vm35_vm0 = vcmp.ge.s32.totalorder %v1155_v7, 1  ;;  %v1173_v13 = vand.u32 127, %v53_v9 }
   0x4   :  { %889 = vrot.lane.b32.xlu1 %v888_v4, %s1049_s17  ;;  %vm36_vm1 = vcmp.ge.s32.totalorder %v1160_v8, 1  ;;  %vm38_vm2 = vcmp.le.s32.totalorder %v1160_v8, 14  ;;  %v1169_v11 = vsub.s32 1, %v60_v10  ;;  %v1171_v12 = vsub.s32 0, %v60_v10 }
   0x5   :  { %879 = vrot.lane.b32.xlu0 %v878_v6, %s1049_s17  ;;  %vm37_vm3 = vmand %vm35_vm0, %vm36_vm1  ;;  %v78_v15 = vsel %vm35_vm0, 1, %v1048_v3  ;;  %v118_v17 = vsel %vm36_vm1, 1, %v1048_v3  ;;  %vm1684_vm5 = vcmp.lt.s32.totalorder %v1173_v13, 1  ;;  %vm1685_vm6 = vcmp.lt.s32.totalorder %v1173_v13, 15 }
   0x6   :  { %vm39_vm4 = vmand %vm35_vm0, %vm38_vm2  ;;  %v58_v14 = vsel %vm37_vm3, 1, %v1048_v3  ;;  %v86_v20 = vrot.slane %v78_v15, %v1169_v11  ;;  %v82_v22 = vrot.slane %v78_v15, %v1171_v12  ;;  %vm55_vm7 = vcmp.lt.s32.totalorder %v1173_v13, 17 }
   0x7   :  { %v98_v16 = vsel %vm39_vm4, 1, %v1048_v3  ;;  %v66_v19 = vrot.slane %v58_v14, %v1169_v11  ;;  %v62_v21 = vrot.slane %v58_v14, %v1171_v12  ;;  %vm75_vm8 = vcmp.lt.s32.totalorder %v1173_v13, 16 }
   0x8   :  { %894 = vrot.lane.b32.xlu1 %v888_v4, %s1050_s18  ;;  %v106_v24 = vrot.slane %v98_v16, %v1169_v11  ;;  %v126_v25 = vrot.slane %v118_v17, %v1169_v11  ;;  %v1194_v28 = vsel %vm38_vm2, 1, %v1048_v3  ;;  %vm40_vm9 = vcmp.le.s32.totalorder %v1155_v7, 14 }
   0x9   :  { %884 = vrot.lane.b32.xlu0 %v878_v6, %s1050_s18  ;;  %v102_v31 = vrot.slane %v98_v16, %v1171_v12  ;;  %v122_v32 = vrot.slane %v118_v17, %v1171_v12  ;;  %vm1199_vm10 = vcmp.eq.s32.totalorder %v66_v19, 1  ;;  %vm88_vm11 = vcmp.eq.s32.totalorder %v86_v20, 1  ;;  %vm1227_vm0 = vmand %vm40_vm9, %vm36_vm1 }
   0xa   :  { %vm1203_vm12 = vcmp.eq.s32.totalorder %v62_v21, 1  ;;  %vm1207_vm13 = vcmp.eq.s32.totalorder %v82_v22, 1  ;;  %vm1211_vm14 = vcmp.eq.s32.totalorder %v106_v24, 1  ;;  %vm1215_vm15 = vcmp.eq.s32.totalorder %v126_v25, 1  ;;  %vm1235_vm3 = vmpackc.low %vm88_vm11, %vm1199_vm10 }
   0xb   :  { %vm1253_vm1 = vmpackc.low %vm1207_vm13, %vm1203_vm12  ;;  %vm1686_vm4 = vcmp.lt.s32.totalorder %v1173_v13, 127  ;;  %vm1260_vm10 = vcmp.eq.s32.totalorder %v102_v31, 1  ;;  %vm1264_vm11 = vcmp.eq.s32.totalorder %v122_v32, 1  ;;  %v146_v15 = vrot.slane %v1194_v28, %v1169_v11 }
   0xc   :  { %904 = vrot.lane.b32.xlu1 %v878_v6, %s1051_s19  ;;  %v158_v16 = vsel %vm1227_vm0, 1, %v1048_v3  ;;  %vm1291_vm12 = vmpackc.low %vm1215_vm15, %vm1211_vm14  ;;  %vm1687_vm13 = vcmp.lt.s32.totalorder %v1173_v13, 112  ;;  %v142_v21 = vrot.slane %v1194_v28, %v1171_v12  ;;  %v178_v22 = vsel %vm40_vm9, 1, %v1048_v3 }
   0xd   :  { %899 = vrot.lane.b32.xlu0 %v878_v6, %s1052_s20  ;;  %vm1305_vm14 = vmpackc.low %vm1264_vm11, %vm1260_vm10  ;;  %vm155_vm15 = vcmp.lt.s32.totalorder %v1173_v13, 113  ;;  %v166_v31 = vrot.slane %v158_v16, %v1169_v11  ;;  %vm1317_vm0 = vcmp.eq.s32.totalorder %v146_v15, 1  ;;  %v186_v35 = vrot.slane %v178_v22, %v1169_v11 }
   0xe   :  { %vm1328_vm10 = vcmp.eq.s32.totalorder %v142_v21, 1  ;;  %vm1336_vm11 = vmand %vm40_vm9, %vm38_vm2  ;;  %v162_v41 = vrot.slane %v158_v16, %v1171_v12  ;;  %v182_v8 = vrot.slane %v178_v22, %v1171_v12  ;;  %vm1057_vm2 = vmmov 1  }
   0xf   :  { %vm1355_vm9 = vmpackc.low %vm1317_vm0, %vm1057_vm2 }
  0x10   :  { %914 = vrot.lane.b32.xlu1 %v888_v4, %s1051_s19  ;;  %vm1379_vm0 = vmpackc.low %vm1328_vm10, %vm1057_vm2 }
  0x11   :  { %909 = vrot.lane.b32.xlu0 %v888_v4, %s1052_s20 }
  0x14   :  { %924 = vrot.lane.b32.xlu1 %v888_v4, %s1053_s21 }
  0x15   :  { %919 = vrot.lane.b32.xlu0 %v878_v6, %s1053_s21 }
  0x18   :  { %934 = vrot.lane.b32.xlu1 %v878_v6, %s1054_s22 }
  0x19   :  { %929 = vrot.lane.b32.xlu0 %v878_v6, %s1055_s23 }
  0x1c   :  { %944 = vrot.lane.b32.xlu1 %v888_v4, %s1054_s22 }
  0x1d   :  { %939 = vrot.lane.b32.xlu0 %v888_v4, %s1055_s23 }
  0x20   :  { %954 = vrot.lane.b32.xlu1 %v888_v4, %s1056_s24 }
  0x21   :  { %949 = vrot.lane.b32.xlu0 %v878_v6, %s1056_s24 }
  0x76   :  { %v890_v18 = vpop.permute.xlu1 %889 }
  0x77   :  { %v880_v23 = vpop.permute.xlu0 %879  ;;  %v892_v26 = vunpack.i.h.bf16 %v890_v18  ;;  %v891_v27 = vunpack.i.l.bf16 %v890_v18 }
  0x78   :  { %v882_v29 = vunpack.i.h.bf16 %v880_v23  ;;  %v881_v30 = vunpack.i.l.bf16 %v880_v23 }
  0x79   :  { %v277_v44 = vsel %vm55_vm7, %v891_v27, %v892_v26  ;;  %v278_v45 = vsel %vm55_vm7, %v892_v26, %v891_v27 }
  0x7a   :  { %v895_v33 = vpop.permute.xlu1 %894  ;;  %v56_v47 = vsel %vm55_vm7, %v881_v30, %v882_v29  ;;  %v57_v50 = vsel %vm55_vm7, %v882_v29, %v881_v30 }
  0x7b   :  { %v897_v37 = vunpack.i.h.bf16 %v895_v33  ;;  %v896_v38 = vunpack.i.l.bf16 %v895_v33  ;;  %v885_v39 = vpop.permute.xlu0 %884 }
  0x7c   :  { %v887_v42 = vunpack.i.h.bf16 %v885_v39  ;;  %v886_v43 = vunpack.i.l.bf16 %v885_v39 }
  0x7d   :  { %v285_v49 = vsel %vm75_vm8, %v896_v38, %v897_v37  ;;  %v286_v51 = vsel %vm75_vm8, %v897_v37, %v896_v38 }
  0x7e   :  { %v905_v52 = vpop.permute.xlu1 %904  ;;  %v76_v53 = vsel %vm75_vm8, %v886_v43, %v887_v42  ;;  %v789_v54 = vpack.c.bf16 %v285_v49, %v277_v44  ;;  %v77_v55 = vsel %vm75_vm8, %v887_v42, %v886_v43  ;;  %v792_v57 = vpack.c.bf16 %v286_v51, %v278_v45 }
  0x7f   :  { %v907_v58 = vunpack.i.h.bf16 %v905_v52  ;;  %v906_v59 = vunpack.i.l.bf16 %v905_v52  ;;  %v900_v60 = vpop.permute.xlu0 %899  ;;  %v763_v61 = vpack.c.bf16 %v76_v53, %v56_v47  ;;  %v766_v62 = vpack.c.bf16 %v77_v55, %v57_v50 }
  0x80   :  { %v902_v63 = vunpack.i.h.bf16 %v900_v60  ;;  %v901_v4 = vunpack.i.l.bf16 %v900_v60  ;;  %790 = vmatprep.subr.msk.bf16.mxu1 %vm1235_vm3, %v789_v54  ;;  %v198_v54 = vsel %vm1336_vm11, 1, %v1048_v3  ;;  %vm1385_vm11 = vcmp.eq.s32.totalorder %v162_v41, 1 }
  0x81   :  { %v116_v10 = vsel %vm1684_vm5, %v906_v59, %v907_v58  ;;  %v117_v14 = vsel %vm1684_vm5, %v907_v58, %v906_v59  ;;  %764 = vmatprep.subr.msk.bf16.mxu0 %vm1235_vm3, %v763_v61  ;;  %793 = vmatpush1.bf16.msk.msra.mxu1 %vm1253_vm1, %v792_v57  ;;  %v206_v15 = vrot.slane %v198_v54, %v1169_v11 }
  0x82   :  { %v96_v17 = vsel %vm1685_vm6, %v901_v4, %v902_v63  ;;  %v97_v18 = vsel %vm1685_vm6, %v902_v63, %v901_v4  ;;  %767 = vmatpush1.bf16.msk.msra.mxu0 %vm1253_vm1, %v766_v62  ;;  %v915_v19 = vpop.permute.xlu1 %914  ;;  %v202_v11 = vrot.slane %v198_v54, %v1171_v12 }
  0x83   :  { %v769_v23 = vpack.c.bf16 %v116_v10, %v96_v17  ;;  %v772_v24 = vpack.c.bf16 %v117_v14, %v97_v18  ;;  %v917_v25 = vunpack.i.h.bf16 %v915_v19  ;;  %v916_v26 = vunpack.i.l.bf16 %v915_v19  ;;  %v910_v27 = vpop.permute.xlu0 %909 }
  0x84   :  { %v912_v28 = vunpack.i.h.bf16 %v910_v27  ;;  %v911_v30 = vunpack.i.l.bf16 %v910_v27 }
  0x85   :  { %v301_v32 = vsel %vm1684_vm5, %v916_v26, %v917_v25  ;;  %v302_v33 = vsel %vm1684_vm5, %v917_v25, %v916_v26  ;;  %770 = vmatprep.subr.msk.bf16.mxu0 %vm1291_vm12, %v769_v23  ;;  %vm1341_vm5 = vcmp.eq.s32.totalorder %v166_v31, 1 }
  0x86   :  { %v293_v36 = vsel %vm1685_vm6, %v911_v30, %v912_v28  ;;  %v294_v37 = vsel %vm1685_vm6, %v912_v28, %v911_v30  ;;  %773 = vmatpush1.bf16.msk.msra.mxu0 %vm1305_vm14, %v772_v24  ;;  %v925_v38 = vpop.permute.xlu1 %924  ;;  %vm1359_vm6 = vcmp.eq.s32.totalorder %v186_v35, 1 }
  0x87   :  { %v795_v42 = vpack.c.bf16 %v301_v32, %v293_v36  ;;  %v798_v43 = vpack.c.bf16 %v302_v33, %v294_v37  ;;  %v927_v44 = vunpack.i.h.bf16 %v925_v38  ;;  %v926_v45 = vunpack.i.l.bf16 %v925_v38  ;;  %v920_v46 = vpop.permute.xlu0 %919  ;;  %vm1412_vm10 = vmpackc.low %vm1359_vm6, %vm1341_vm5 }
  0x88   :  { %v922_v47 = vunpack.i.h.bf16 %v920_v46  ;;  %v921_v49 = vunpack.i.l.bf16 %v920_v46  ;;  %vm195_vm5 = vcmp.lt.s32.totalorder %v1173_v13, 111  ;;  %vm1438_vm6 = vcmp.eq.s32.totalorder %v206_v15, 1 }
  0x89   :  { %v309_v7 = vsel %vm1686_vm4, %v926_v45, %v927_v44  ;;  %v310_v51 = vsel %vm1686_vm4, %v927_v44, %v926_v45  ;;  %796 = vmatprep.subr.msk.bf16.mxu1 %vm1291_vm12, %v795_v42 }
  0x8a   :  { %v801_v55 = vpack.c.bf16 %v310_v51, %v1116_v1  ;;  %v804_v57 = vpack.c.bf16 %v309_v7, %v1111_v0  ;;  %v136_v58 = vsel %vm1686_vm4, %v921_v49, %v922_v47  ;;  %v137_v59 = vsel %vm1686_vm4, %v922_v47, %v921_v49  ;;  %799 = vmatpush1.bf16.msk.msra.mxu1 %vm1305_vm14, %v798_v43  ;;  %v935_v60 = vpop.permute.xlu1 %934 }
  0x8b   :  { %v775_v61 = vpack.c.bf16 %v137_v59, %v1130_v5  ;;  %v778_v62 = vpack.c.bf16 %v136_v58, %v1121_v2  ;;  %v937_v63 = vunpack.i.h.bf16 %v935_v60  ;;  %v936_v4 = vunpack.i.l.bf16 %v935_v60  ;;  %v930_v6 = vpop.permute.xlu0 %929  ;;  %v48_v58 = vld [vmem:[%s1677_s3] sm:$0xf] }
  0x8c   :  { %v932_v1 = vunpack.i.h.bf16 %v930_v6  ;;  %v931_v9 = vunpack.i.l.bf16 %v930_v6  ;;  %802 = vmatprep.subr.msk.bf16.mxu1 %vm1355_vm9, %v801_v55  ;;  %vm1389_vm4 = vcmp.eq.s32.totalorder %v182_v8, 1 }
  0x8d   :  { %v176_v5 = vsel %vm1687_vm13, %v936_v4, %v937_v63  ;;  %v177_v14 = vsel %vm1687_vm13, %v937_v63, %v936_v4  ;;  %776 = vmatprep.subr.msk.bf16.mxu0 %vm1355_vm9, %v775_v61  ;;  %vm1421_vm2 = vmpackc.low %vm1389_vm4, %vm1385_vm11  ;;  %vm1442_vm4 = vcmp.eq.s32.totalorder %v202_v11, 1  ;;  %vm1689_vm11 = vcmask 1043456  }
  0x8e   :  { %v156_v16 = vsel %vm155_vm15, %v931_v9, %v932_v1  ;;  %v157_v17 = vsel %vm155_vm15, %v932_v1, %v931_v9  ;;  %779 = vmatpush1.bf16.msk.msra.mxu0 %vm1379_vm0, %v778_v62  ;;  %805 = vmatpush1.bf16.msk.msra.mxu1 %vm1379_vm0, %v804_v57  ;;  %v945_v18 = vpop.permute.xlu1 %944 }
  0x8f   :  { %v781_v21 = vpack.c.bf16 %v177_v14, %v157_v17  ;;  %v784_v22 = vpack.c.bf16 %v176_v5, %v156_v16  ;;  %v947_v23 = vunpack.i.h.bf16 %v945_v18  ;;  %v946_v24 = vunpack.i.l.bf16 %v945_v18  ;;  %v940_v25 = vpop.permute.xlu0 %939 }
  0x90   :  { %v942_v27 = vunpack.i.h.bf16 %v940_v25  ;;  %v941_v28 = vunpack.i.l.bf16 %v940_v25 }
  0x91   :  { %v325_v30 = vsel %vm1687_vm13, %v946_v24, %v947_v23  ;;  %v326_v12 = vsel %vm1687_vm13, %v947_v23, %v946_v24  ;;  %782 = vmatprep.subr.msk.bf16.mxu0 %vm1412_vm10, %v781_v21  ;;  %vm1688_vm13 = vcmask 588800  }
  0x92   :  { %v317_v31 = vsel %vm155_vm15, %v941_v28, %v942_v27  ;;  %v318_v32 = vsel %vm155_vm15, %v942_v27, %v941_v28  ;;  %785 = vmatpush1.bf16.msk.msra.mxu0 %vm1421_vm2, %v784_v22  ;;  %v955_v34 = vpop.permute.xlu1 %954  ;;  %v425_v27 = vld [vmem:[%s1678_s5] sm:$0xff] }
  0x93   :  { %v807_v36 = vpack.c.bf16 %v326_v12, %v318_v32  ;;  %v810_v37 = vpack.c.bf16 %v325_v30, %v317_v31  ;;  %v957_v38 = vunpack.i.h.bf16 %v955_v34  ;;  %v956_v39 = vunpack.i.l.bf16 %v955_v34  ;;  %v950_v40 = vpop.permute.xlu0 %949  ;;  %v421_v34 = vld [vmem:[%s1679_s4] sm:$0xff] }
  0x94   :  { %v952_v41 = vunpack.i.h.bf16 %v950_v40  ;;  %v951_v42 = vunpack.i.l.bf16 %v950_v40 }
  0x95   :  { %v334_v43 = vsel %vm195_vm5, %v957_v38, %v956_v39  ;;  %808 = vmatprep.subr.msk.bf16.mxu1 %vm1412_vm10, %v807_v36  ;;  %v333_v44 = vsel %vm195_vm5, %v956_v39, %v957_v38 }
  0x96   :  { %v336_v45 = vsel %vm1438_vm6, %v334_v43, 0.0  ;;  %v197_v46 = vsel %vm195_vm5, %v952_v41, %v951_v42  ;;  %811 = vmatpush1.bf16.msk.msra.mxu1 %vm1421_vm2, %v810_v37  ;;  %v196_v47 = vsel %vm195_vm5, %v951_v42, %v952_v41  ;;  %v335_v49 = vsel %vm1442_vm4, %v333_v44, 0.0 }
  0x97   :  { %v210_v50 = vsel %vm1438_vm6, %v197_v46, 0.0  ;;  %v346_v8 = vpack.c.bf16 %v336_v45, %v336_v45  ;;  %v209_v7 = vsel %vm1442_vm4, %v196_v47, 0.0  ;;  %v345_v51 = vpack.c.bf16 %v335_v49, %v335_v49 }
  0x98   :  { %v220_v53 = vpack.c.bf16 %v210_v50, %v210_v50  ;;  %v219_v54 = vpack.c.bf16 %v209_v7, %v209_v7 }
  0x99   :  { %812 = vmatprep.subr.msk.bf16.mxu1 %vm1689_vm11, %v346_v8  ;;  %v348_v55 = vsel %vm1689_vm11, %v345_v51, 0 }
  0x9a   :  { %786 = vmatprep.subr.msk.bf16.mxu0 %vm1689_vm11, %v220_v53  ;;  %v227_v57 = vsel %vm1689_vm11, %v219_v54, 0  ;;  %362 = vmatpush1.bf16.msra.mxu1 %v348_v55 }
  0x9b   :  { %241 = vmatpush1.bf16.msra.mxu0 %v227_v57 }
  0x9d   :  { %813 = vmatmul.mubr.msk.bf16.vlgmr.msra.gmra.mrb[0].mxu1 %vm1688_vm13, %v48_v58 }
  0x9e   :  { %787 = vmatmul.mubr.msk.bf16.vlgmr.msra.gmra.mrb[0].mxu0 %vm1688_vm13, %v48_v58  ;;  %685 = vmatprep.mubr.bf16.mxu1 %v1048_v3 }
  0x9f   :  { %564 = vmatprep.mubr.bf16.mxu0 %v1048_v3 }
 0x170   :  { %v387_v59 = vpop.f32.mrb[0].mxu1 }
 0x171   :  { %v266_v60 = vpop.f32.mrb[0].mxu0  ;;  %v389_v61 = vpop.f32.mrb[1].mxu1 }
 0x172   :  { %v268_v62 = vpop.f32.mrb[1].mxu0  ;;  %v391_v63 = vpop.f32.mrb[2].mxu1  ;;  %v398_v4 = vadd.f32 %v389_v61, %v387_v59 }
 0x173   :  { %v270_v6 = vpop.f32.mrb[2].mxu0  ;;  %v392_v1 = vpop.f32.mrb[3].mxu1  ;;  %v394_v9 = vadd.f32 %v268_v62, %v266_v60 }
 0x174   :  { %v271_v10 = vpop.f32.mrb[3].mxu0  ;;  %399 = vadd.xlane.f32.xlu1 %v398_v4 }
 0x175   :  { %395 = vadd.xlane.f32.xlu0 %v394_v9 }
 0x201   :  { %v400_v2 = vpop.xlane.xlu1 %399 }
 0x202   :  { %v396_v5 = vpop.xlane.xlu0 %395 }
 0x203   :  { %v401_v14 = vadd.f32 %v400_v2, %v396_v5 }
 0x205   :  { %v403_v15 = vmul.f32 0.001953125, %v401_v14 }
 0x207   :  { %v404_v16 = vsub.f32 %v266_v60, %v403_v15  ;;  %v405_v17 = vsub.f32 %v268_v62, %v403_v15  ;;  %v406_v18 = vsub.f32 %v387_v59, %v403_v15  ;;  %v407_v3 = vsub.f32 %v389_v61, %v403_v15 }
 0x209   :  { %v408_v11 = vmul.f32 %v404_v16, %v404_v16  ;;  %v409_v21 = vmul.f32 %v405_v17, %v405_v17  ;;  %v414_v23 = vmul.f32 %v406_v18, %v406_v18  ;;  %v415_v24 = vmul.f32 %v407_v3, %v407_v3 }
 0x20b   :  { %v410_v22 = vadd.f32 %v409_v21, %v408_v11  ;;  %v416_v25 = vadd.f32 %v415_v24, %v414_v23 }
 0x20d   :  { %411 = vadd.xlane.f32.xlu0 %v410_v22 }
 0x211   :  { %417 = vadd.xlane.f32.xlu0 %v416_v25 }
 0x227   :  { %435 = vperm.xlu0 %959, %v425_v27  }
 0x29a   :  { %v412_v28 = vpop.xlane.xlu0 %411 }
 0x29e   :  { %v418_v30 = vpop.xlane.xlu0 %417 }
 0x29f   :  { %v419_v12 = vadd.f32 %v418_v30, %v412_v28 }
 0x2a1   :  { %v420_v31 = vmul.f32 0.001953125, %v419_v12 }
 0x2a3   :  { %v422_v32 = vadd.f32 1e-05, %v420_v31 }
 0x2a5   :  { %1040 = vrsqrt.f32 %v422_v32 }
 0x2a6   :  { %v436_v39 = vpop.permute.xlu0 %435 }
 0x2af   :  { %v1041_v36 = vpop.eup %1040 }
 0x2b0   :  { %v424_v37 = vmul.f32 %v1041_v36, %v421_v34 }
 0x2b2   :  { %428 = vperm.xlu1 %958, %v424_v37  }
 0x331   :  { %v429_v38 = vpop.permute.xlu1 %428 }
 0x332   :  { %v431_v40 = vmul.f32 %v429_v38, %v404_v16  ;;  %v432_v41 = vmul.f32 %v429_v38, %v405_v17  ;;  %v440_v42 = vmul.f32 %v429_v38, %v406_v18  ;;  %v441_v43 = vmul.f32 %v429_v38, %v407_v3 }
 0x334   :  { %v1483_v44 = vadd.f32 %v436_v39, %v431_v40  ;;  %v1485_v45 = vadd.f32 %v436_v39, %v432_v41  ;;  %v1489_v49 = vadd.f32 %v440_v42, %v436_v39  ;;  %v1491_v50 = vadd.f32 %v441_v43, %v436_v39 }
 0x336   :  { %v444_v46 = vmax.f32 %v1483_v44, 0.0  ;;  %v445_v47 = vmax.f32 %v1485_v45, 0.0  ;;  %v446_v7 = vmax.f32 %v1489_v49, 0.0  ;;  %v447_v51 = vmax.f32 %v1491_v50, 0.0 }
 0x338   :  { %v1000_v8 = vpack.i.bf16 %v445_v47, %v444_v46  ;;  %v1020_v53 = vpack.i.bf16 %v447_v51, %v446_v7 }
 0x33a   :  { %1001 = vrot.lane.b32.xlu0 %v1000_v8, %s1053_s21  ;;  %961 = vrot.lane.b32.xlu1 %v1000_v8, %s1049_s17 }
 0x33e   :  { %1011 = vrot.lane.b32.xlu0 %v1000_v8, %s1055_s23  ;;  %966 = vrot.lane.b32.xlu1 %v1000_v8, %s1050_s18 }
 0x342   :  { %1021 = vrot.lane.b32.xlu0 %v1020_v53, %s1055_s23  ;;  %971 = vrot.lane.b32.xlu1 %v1020_v53, %s1049_s17 }
 0x346   :  { %1031 = vrot.lane.b32.xlu0 %v1000_v8, %s1056_s24  ;;  %976 = vrot.lane.b32.xlu1 %v1020_v53, %s1050_s18 }
 0x34a   :  { %981 = vrot.lane.b32.xlu1 %v1000_v8, %s1052_s20 }
 0x34e   :  { %986 = vrot.lane.b32.xlu1 %v1000_v8, %s1051_s19 }
 0x352   :  { %991 = vrot.lane.b32.xlu1 %v1020_v53, %s1052_s20 }
 0x356   :  { %996 = vrot.lane.b32.xlu1 %v1020_v53, %s1051_s19 }
 0x35a   :  { %1006 = vrot.lane.b32.xlu1 %v1020_v53, %s1053_s21 }
 0x35e   :  { %1016 = vrot.lane.b32.xlu1 %v1000_v8, %s1054_s22 }
 0x362   :  { %1026 = vrot.lane.b32.xlu1 %v1020_v53, %s1054_s22 }
 0x366   :  { %1036 = vrot.lane.b32.xlu1 %v1020_v53, %s1056_s24 }
 0x3ac   :  { %v962_v54 = vpop.permute.xlu1 %961  ;;  %v1002_v10 = vpop.permute.xlu0 %1001 }
 0x3ad   :  { %v964_v55 = vunpack.i.h.bf16 %v962_v54  ;;  %v963_v57 = vunpack.i.l.bf16 %v962_v54  ;;  %v1004_v25 = vunpack.i.h.bf16 %v1002_v10  ;;  %v1003_v27 = vunpack.i.l.bf16 %v1002_v10 }
 0x3af   :  { %v453_v61 = vsel %vm55_vm7, %v963_v57, %v964_v55  ;;  %v454_v62 = vsel %vm55_vm7, %v964_v55, %v963_v57 }
 0x3b0   :  { %v967_v58 = vpop.permute.xlu1 %966  ;;  %v1012_v24 = vpop.permute.xlu0 %1011 }
 0x3b1   :  { %v969_v59 = vunpack.i.h.bf16 %v967_v58  ;;  %v968_v60 = vunpack.i.l.bf16 %v967_v58  ;;  %v1013_v10 = vunpack.i.l.bf16 %v1012_v24 }
 0x3b3   :  { %v461_v63 = vsel %vm75_vm8, %v968_v60, %v969_v59  ;;  %v462_v4 = vsel %vm75_vm8, %v969_v59, %v968_v60 }
 0x3b4   :  { %v815_v6 = vpack.c.bf16 %v461_v63, %v453_v61  ;;  %v818_v1 = vpack.c.bf16 %v462_v4, %v454_v62  ;;  %v972_v9 = vpop.permute.xlu1 %971  ;;  %v1545_v36 = vpop.permute.xlu0 %1021 }
 0x3b5   :  { %v974_v2 = vunpack.i.h.bf16 %v972_v9  ;;  %v973_v5 = vunpack.i.l.bf16 %v972_v9  ;;  %v1014_v9 = vunpack.i.h.bf16 %v1012_v24 }
 0x3b6   :  { %816 = vmatprep.subr.msk.bf16.mxu0 %vm1235_vm3, %v815_v6 }
 0x3b7   :  { %819 = vmatpush1.bf16.msk.msra.mxu0 %vm1253_vm1, %v818_v1  ;;  %v577_v17 = vsel %vm55_vm7, %v973_v5, %v974_v2  ;;  %v578_v18 = vsel %vm55_vm7, %v974_v2, %v973_v5  ;;  %vm1740_vm7 = vcmp.lt.s32.totalorder %v1173_v13, 127  ;;  %v494_v29 = vsel %vm155_vm15, %v1014_v9, %v1013_v10 }
 0x3b8   :  { %v977_v14 = vpop.permute.xlu1 %976  ;;  %v486_v34 = vsel %vm1740_vm7, %v1004_v25, %v1003_v27  ;;  %v1032_v57 = vpop.permute.xlu0 %1031 }
 0x3b9   :  { %v979_v15 = vunpack.i.h.bf16 %v977_v14  ;;  %v978_v16 = vunpack.i.l.bf16 %v977_v14  ;;  %v827_v43 = vpack.c.bf16 %v486_v34, %v445_v47  ;;  %v1034_v44 = vunpack.i.h.bf16 %v1032_v57 }
 0x3bb   :  { %v585_v3 = vsel %vm75_vm8, %v978_v16, %v979_v15  ;;  %v586_v11 = vsel %vm75_vm8, %v979_v15, %v978_v16  ;;  %vm1741_vm8 = vcmp.lt.s32.totalorder %v1173_v13, 15 }
 0x3bc   :  { %v841_v21 = vpack.c.bf16 %v585_v3, %v577_v17  ;;  %v844_v22 = vpack.c.bf16 %v586_v11, %v578_v18  ;;  %v982_v23 = vpop.permute.xlu1 %981  ;;  %vm1742_vm13 = vmmov %vm1741_vm8  ;;  %v493_v11 = vsel %vm155_vm15, %v1013_v10, %v1014_v9 }
 0x3bd   :  { %v984_v28 = vunpack.i.h.bf16 %v982_v23  ;;  %v983_v30 = vunpack.i.l.bf16 %v982_v23 }
 0x3be   :  { %842 = vmatprep.subr.msk.bf16.mxu1 %vm1235_vm3, %v841_v21  ;;  %vm1743_vm3 = vcmp.lt.s32.totalorder %v1173_v13, 1  ;;  %v1024_v21 = vunpack.i.h.bf16 %v1545_v36 }
 0x3bf   :  { %845 = vmatpush1.bf16.msk.msra.mxu1 %vm1253_vm1, %v844_v22  ;;  %v469_v37 = vsel %vm1741_vm8, %v983_v30, %v984_v28  ;;  %v470_v48 = vsel %vm1742_vm13, %v984_v28, %v983_v30  ;;  %vm1744_vm11 = vmmov %vm1743_vm3  ;;  %v1023_v22 = vunpack.i.l.bf16 %v1545_v36 }
 0x3c0   :  { %v987_v12 = vpop.permute.xlu1 %986  ;;  %vm1745_vm1 = vmmov %vm1740_vm7 }
 0x3c1   :  { %v989_v31 = vunpack.i.h.bf16 %v987_v12  ;;  %v988_v32 = vunpack.i.l.bf16 %v987_v12  ;;  %v485_v42 = vsel %vm1745_vm1, %v1003_v27, %v1004_v25  ;;  %vm1746_vm13 = vmmov %vm1741_vm8  ;;  %v617_v12 = vsel %vm155_vm15, %v1023_v22, %v1024_v21 }
 0x3c2   :  { %v830_v55 = vpack.c.bf16 %v485_v42, %v444_v46  ;;  %vm1748_vm7 = vmmov %vm1743_vm3  ;;  %v1033_v46 = vunpack.i.l.bf16 %v1032_v57  ;;  %v618_v0 = vsel %vm155_vm15, %v1024_v21, %v1023_v22 }
 0x3c3   :  { %v477_v38 = vsel %vm1743_vm3, %v988_v32, %v989_v31  ;;  %v478_v56 = vsel %vm1744_vm11, %v989_v31, %v988_v32  ;;  %vm1747_vm11 = vmmov %vm1741_vm8 }
 0x3c4   :  { %v821_v39 = vpack.c.bf16 %v477_v38, %v469_v37  ;;  %v824_v40 = vpack.c.bf16 %v478_v56, %v470_v48  ;;  %v992_v41 = vpop.permute.xlu1 %991  ;;  %vm1749_vm8 = vmmov %vm1743_vm3  ;;  %v509_v14 = vsel %vm195_vm5, %v1033_v46, %v1034_v44  ;;  %v510_v15 = vsel %vm195_vm5, %v1034_v44, %v1033_v46 }
 0x3c5   :  { %v994_v8 = vunpack.i.h.bf16 %v992_v41  ;;  %v993_v53 = vunpack.i.l.bf16 %v992_v41  ;;  %vm1750_vm3 = vmmov %vm1745_vm1  ;;  %v512_v49 = vsel %vm1438_vm6, %v510_v15, 0.0  ;;  %v448_v41 = vld [vmem:[%s1680_s6] sm:$0xf] }
 0x3c6   :  { %822 = vmatprep.subr.msk.bf16.mxu0 %vm1291_vm12, %v821_v39  ;;  %v522_v28 = vpack.c.bf16 %v512_v49, %v512_v49 }
 0x3c7   :  { %825 = vmatpush1.bf16.msk.msra.mxu0 %vm1305_vm14, %v824_v40  ;;  %v593_v45 = vsel %vm1746_vm13, %v993_v53, %v994_v8  ;;  %v594_v47 = vsel %vm1747_vm11, %v994_v8, %v993_v53  ;;  %vm1755_vm13 = vcmask 1043456  }
 0x3c8   :  { %v997_v54 = vpop.permute.xlu1 %996  ;;  %828 = vmatprep.subr.msk.bf16.mxu0 %vm1355_vm9, %v827_v43  ;;  %vm1756_vm15 = vmmov %vm1755_vm13 }
 0x3c9   :  { %v999_v58 = vunpack.i.h.bf16 %v997_v54  ;;  %v998_v59 = vunpack.i.l.bf16 %v997_v54  ;;  %vm1758_vm11 = vmmov %vm1755_vm13 }
 0x3cb   :  { %v601_v60 = vsel %vm1748_vm7, %v998_v59, %v999_v58  ;;  %v602_v61 = vsel %vm1749_vm8, %v999_v58, %v998_v59  ;;  %831 = vmatpush1.bf16.msk.msra.mxu0 %vm1379_vm0, %v830_v55 }
 0x3cc   :  { %v847_v62 = vpack.c.bf16 %v601_v60, %v593_v45  ;;  %v850_v63 = vpack.c.bf16 %v602_v61, %v594_v47  ;;  %v1007_v4 = vpop.permute.xlu1 %1006 }
 0x3cd   :  { %v1009_v6 = vunpack.i.h.bf16 %v1007_v4  ;;  %v1008_v1 = vunpack.i.l.bf16 %v1007_v4 }
 0x3ce   :  { %848 = vmatprep.subr.msk.bf16.mxu1 %vm1291_vm12, %v847_v62  ;;  %vm1751_vm12 = vcmp.lt.s32.totalorder %v1173_v13, 112 }
 0x3cf   :  { %v609_v2 = vsel %vm1750_vm3, %v1008_v1, %v1009_v6  ;;  %v610_v5 = vsel %vm1745_vm1, %v1009_v6, %v1008_v1  ;;  %851 = vmatpush1.bf16.msk.msra.mxu1 %vm1305_vm14, %v850_v63  ;;  %vm1752_vm14 = vmmov %vm1751_vm12 }
 0x3d0   :  { %v853_v16 = vpack.c.bf16 %v610_v5, %v447_v51  ;;  %v856_v20 = vpack.c.bf16 %v609_v2, %v446_v7  ;;  %v1017_v17 = vpop.permute.xlu1 %1016  ;;  %v511_v51 = vsel %vm1442_vm4, %v509_v14, 0.0  ;;  %v724_v14 = vld [vmem:[%s1681_s8] sm:$0xff] }
 0x3d1   :  { %v1019_v18 = vunpack.i.h.bf16 %v1017_v17  ;;  %v1018_v3 = vunpack.i.l.bf16 %v1017_v17  ;;  %v521_v30 = vpack.c.bf16 %v511_v51, %v511_v51 }
 0x3d2   :  { %854 = vmatprep.subr.msk.bf16.mxu1 %vm1355_vm9, %v853_v16  ;;  %vm1753_vm9 = vmmov %vm1751_vm12 }
 0x3d3   :  { %v501_v50 = vsel %vm1751_vm12, %v1018_v3, %v1019_v18  ;;  %v502_v7 = vsel %vm1752_vm14, %v1019_v18, %v1018_v3  ;;  %857 = vmatpush1.bf16.msk.msra.mxu1 %vm1379_vm0, %v856_v20  ;;  %vm1754_vm0 = vmmov %vm1753_vm9  ;;  %v527_v56 = vsel %vm1756_vm15, %v521_v30, 0  ;;  %v720_v3 = vld [vmem:[%s1682_s7] sm:$0xff]  ;;  %v1045_v30 = vld [vmem:[%s1674_s0 + $0x8] sm:$0xff] }
 0x3d4   :  { %v833_v23 = vpack.c.bf16 %v502_v7, %v494_v29  ;;  %v836_v24 = vpack.c.bf16 %v501_v50, %v493_v11  ;;  %v1027_v25 = vpop.permute.xlu1 %1026 }
 0x3d5   :  { %v1029_v52 = vunpack.i.h.bf16 %v1027_v25  ;;  %v1028_v27 = vunpack.i.l.bf16 %v1027_v25 }
 0x3d6   :  { %834 = vmatprep.subr.msk.bf16.mxu0 %vm1412_vm10, %v833_v23 }
 0x3d7   :  { %v625_v31 = vsel %vm1753_vm9, %v1028_v27, %v1029_v52  ;;  %v626_v32 = vsel %vm1754_vm0, %v1029_v52, %v1028_v27  ;;  %837 = vmatpush1.bf16.msk.msra.mxu0 %vm1421_vm2, %v836_v24  ;;  %v1044_v27 = vld [vmem:[%s1674_s0] sm:$0xff] }
 0x3d8   :  { %v859_v34 = vpack.c.bf16 %v626_v32, %v618_v0  ;;  %v862_v36 = vpack.c.bf16 %v625_v31, %v617_v12  ;;  %v1037_v37 = vpop.permute.xlu1 %1036  ;;  %838 = vmatprep.subr.msk.bf16.mxu0 %vm1755_vm13, %v522_v28  ;;  %v1046_v0 = vld [vmem:[%s1674_s0 + $0x10] sm:$0xff]  ;;  %v1047_v32 = vld [vmem:[%s1674_s0 + $0x18] sm:$0xff] }
 0x3d9   :  { %v1039_v48 = vunpack.i.h.bf16 %v1037_v37  ;;  %v1038_v38 = vunpack.i.l.bf16 %v1037_v37 }
 0x3da   :  { %860 = vmatprep.subr.msk.bf16.mxu1 %vm1412_vm10, %v859_v34  ;;  %vm1757_vm10 = vcmask 588800  }
 0x3db   :  { %v633_v39 = vsel %vm195_vm5, %v1038_v38, %v1039_v48  ;;  %v634_v40 = vsel %vm195_vm5, %v1039_v48, %v1038_v38  ;;  %541 = vmatpush1.bf16.msra.mxu0 %v527_v56  ;;  %863 = vmatpush1.bf16.msk.msra.mxu1 %vm1421_vm2, %v862_v36  ;;  %vm1759_vm5 = vmmov %vm1758_vm11 }
 0x3dc   :  { %v636_v19 = vsel %vm1438_vm6, %v634_v40, 0.0  ;;  %v635_v42 = vsel %vm1442_vm4, %v633_v39, 0.0  ;;  %vm1760_vm2 = vmmov %vm1757_vm10 }
 0x3dd   :  { %v646_v43 = vpack.c.bf16 %v636_v19, %v636_v19  ;;  %v645_v8 = vpack.c.bf16 %v635_v42, %v635_v42 }
 0x3de   :  { %839 = vmatmul.mubr.msk.bf16.vlgmr.msra.gmra.mrb[4].mxu0 %vm1757_vm10, %v448_v41 }
 0x3df   :  { %864 = vmatprep.subr.msk.bf16.mxu1 %vm1758_vm11, %v646_v43  ;;  %v648_v13 = vsel %vm1759_vm5, %v645_v8, 0 }
 0x3e0   :  { %662 = vmatpush1.bf16.msra.mxu1 %v648_v13 }
 0x3e3   :  { %865 = vmatmul.mubr.msk.bf16.vlgmr.msra.gmra.mrb[4].mxu1 %vm1760_vm2, %v448_v41 }
 0x4b1   :  { %v566_v26 = vpop.f32.mrb[4].mxu0 }
 0x4b2   :  { %v568_v53 = vpop.f32.mrb[5].mxu0 }
 0x4b3   :  { %v570_v54 = vpop.f32.mrb[6].mxu0  ;;  %v694_v55 = vadd.f32 %v568_v53, %v566_v26 }
 0x4b4   :  { %v571_v33 = vpop.f32.mrb[7].mxu0 }
 0x4b5   :  { %695 = vadd.xlane.f32.xlu0 %v694_v55 }
 0x4b6   :  { %v687_v57 = vpop.f32.mrb[4].mxu1 }
 0x4b7   :  { %v689_v35 = vpop.f32.mrb[5].mxu1 }
 0x4b8   :  { %v691_v58 = vpop.f32.mrb[6].mxu1  ;;  %v698_v59 = vadd.f32 %v689_v35, %v687_v57 }
 0x4b9   :  { %v692_v45 = vpop.f32.mrb[7].mxu1 }
 0x4ba   :  { %699 = vadd.xlane.f32.xlu1 %v698_v59 }
 0x542   :  { %v696_v47 = vpop.xlane.xlu0 %695 }
 0x547   :  { %v700_v60 = vpop.xlane.xlu1 %699 }
 0x548   :  { %v701_v61 = vadd.f32 %v700_v60, %v696_v47 }
 0x54a   :  { %v702_v44 = vmul.f32 0.001953125, %v701_v61 }
 0x54c   :  { %v703_v46 = vsub.f32 %v566_v26, %v702_v44  ;;  %v704_v62 = vsub.f32 %v568_v53, %v702_v44  ;;  %v705_v63 = vsub.f32 %v687_v57, %v702_v44  ;;  %v706_v4 = vsub.f32 %v689_v35, %v702_v44 }
 0x54e   :  { %v707_v6 = vmul.f32 %v703_v46, %v703_v46  ;;  %v708_v1 = vmul.f32 %v704_v62, %v704_v62  ;;  %v713_v10 = vmul.f32 %v705_v63, %v705_v63  ;;  %v714_v2 = vmul.f32 %v706_v4, %v706_v4 }
 0x550   :  { %v709_v9 = vadd.f32 %v708_v1, %v707_v6  ;;  %v715_v5 = vadd.f32 %v714_v2, %v713_v10 }
 0x552   :  { %710 = vadd.xlane.f32.xlu0 %v709_v9 }
 0x556   :  { %716 = vadd.xlane.f32.xlu0 %v715_v5 }
 0x56c   :  { %734 = vperm.xlu0 %959, %v724_v14  }
 0x5df   :  { %v711_v15 = vpop.xlane.xlu0 %710 }
 0x5e3   :  { %v717_v16 = vpop.xlane.xlu0 %716 }
 0x5e4   :  { %v718_v20 = vadd.f32 %v717_v16, %v711_v15 }
 0x5e6   :  { %v719_v17 = vmul.f32 0.001953125, %v718_v20 }
 0x5e8   :  { %v721_v18 = vadd.f32 1e-05, %v719_v17 }
 0x5ea   :  { %1042 = vrsqrt.f32 %v721_v18 }
 0x5eb   :  { %v735_v51 = vpop.permute.xlu0 %734 }
 0x5f4   :  { %v1043_v11 = vpop.eup %1042 }
 0x5f5   :  { %v723_v29 = vmul.f32 %v1043_v11, %v720_v3 }
 0x5f7   :  { %727 = vperm.xlu1 %958, %v723_v29  }
 0x676   :  { %v728_v21 = vpop.permute.xlu1 %727 }
 0x677   :  { %v730_v22 = vmul.f32 %v728_v21, %v703_v46  ;;  %v731_v49 = vmul.f32 %v728_v21, %v704_v62  ;;  %v739_v50 = vmul.f32 %v728_v21, %v705_v63  ;;  %v740_v7 = vmul.f32 %v728_v21, %v706_v4 }
 0x679   :  { %v737_v23 = vadd.f32 %v735_v51, %v730_v22  ;;  %v738_v24 = vadd.f32 %v735_v51, %v731_v49  ;;  %v741_v25 = vadd.f32 %v739_v50, %v735_v51  ;;  %v742_v52 = vadd.f32 %v740_v7, %v735_v51 }
 0x67b   :  { %v743_v28 = vadd.f32 %v1044_v27, %v737_v23  ;;  %v744_v12 = vadd.f32 %v1045_v30, %v738_v24  ;;  %v749_v31 = vadd.f32 %v1046_v0, %v741_v25  ;;  %v750_v34 = vadd.f32 %v1047_v32, %v742_v52 }
 0x67d   :  { %v745_v36 = vmax.f32 %v743_v28, 0.0  ;;  %v746_v37 = vmax.f32 %v744_v12, 0.0  ;;  %v751_v48 = vmax.f32 %v749_v31, 0.0  ;;  %v752_v38 = vmax.f32 %v750_v34, 0.0 }
 0x67f   :  { %747 = vst [vmem:[%s1683_s9] sm:$0xff] %v745_v36  ;;  %748 = vst [vmem:[%s1683_s9 + $0x8] sm:$0xff] %v746_v37 }
 0x680   :  { %866 = vst [vmem:[%s1683_s9 + $0x10] sm:$0xff] %v751_v48  ;;  %867 = vst [vmem:[%s1683_s9 + $0x18] sm:$0xff] %v752_v38 }

</bundles_post_ra>
